<compile_context>
chip_gen: v7x
topology: tpu7x:2x2x1
jax: 0.10.0
libtpu: 0.0.40
codegen_flags: <defaults>
</compile_context>

<pallas_src>
import jax
import jax.numpy as jnp
from jax.experimental import pallas as pl
from jax.experimental.pallas import tpu as pltpu

LANE = 128  # TPU vreg lane width; fc2 output is padded to a multiple of this.


def actor_kernel(x_ref, w1_ref, b1_ref, w2_ref, b2_ref, o_ref):
    # fc1: (B, D) @ (D, H) + (1, H), then ReLU.
    h = jnp.dot(x_ref[...], w1_ref[...], preferred_element_type=jnp.float32)
    h = jnp.maximum(h + b1_ref[...], 0.0)            # (1, H) bias broadcasts over batch

    # fc2 into the lane-padded width.  Padded weight columns are 0 and padded
    # bias columns are -1e30, so padded logits never win the max and exp() of
    # them is exactly 0 -> softmax over the real columns is unchanged.
    logits = jnp.dot(h.astype(w2_ref.dtype), w2_ref[...],
                     preferred_element_type=jnp.float32)
    logits = logits + b2_ref[...]

    # Numerically-stable softmax along the last axis (== F.softmax(dim=-1)).
    m = jnp.max(logits, axis=-1, keepdims=True)
    e = jnp.exp(logits - m)
    denom = jnp.sum(e, axis=-1, keepdims=True)
    # Exact normalization (probabilities must sum to 1 for downstream sampling /
    # log-probs).  pl.reciprocal(approx=True) leaves ~1e-3 error -> don't use it.
    o_ref[...] = (e / denom).astype(o_ref.dtype)


def prepare_actor_params(w1, b1, w2, b2):
    """One-time parameter prep, hoisted out of the per-call forward:
       * biases reshaped to (1, N) 2-D tiles,
       * w2 / b2 padded to a LANE-multiple of output columns so the kernel's
         output stores are lane-dense (no masked vst.msk on 8/128 lanes).
         Padded bias columns are -1e30 (NOT 0) so they never perturb the softmax.
    Weights are stored as (in_features, out_features), i.e. already transposed
    relative to nn.Linear, so the kernel computes y = x @ W + b directly."""
    D, H = w1.shape
    A = w2.shape[1]
    a_pad = ((A + LANE - 1) // LANE) * LANE
    w2p = jnp.zeros((H, a_pad), w2.dtype).at[:, :A].set(w2)
    b2p = jnp.full((1, a_pad), -1e30, jnp.float32).at[0, :A].set(b2.astype(jnp.float32))
    return w1, b1.reshape(1, H).astype(jnp.float32), w2p, b2p


def actor_forward(x, w1, b1_2d, w2p, b2p, num_actions, *,
                  batch_tile=8192, matmul_dtype=None):
    """x: (B, input_size).  Params come from prepare_actor_params().
    Returns (B, num_actions) f32 action probabilities.

    batch_tile=8192: per-tile footprint (x + padded out double-buffered + the
    (tb, 64) hidden intermediate + weights) is only a few MiB — well inside the
    32 MiB scoped VMEM default on v5e/v6e and v7x's 64 MiB; the grid path is
    step-overhead-bound, so big tiles win.
    matmul_dtype=jnp.bfloat16 halves the dominant HBM read traffic (x) and uses
    the native bf16 MXU path (v6e/v7x); post-matmul math stays f32 everywhere.
    """
    B, D = x.shape
    H = w1.shape[1]
    a_pad = w2p.shape[1]
    A = num_actions

    if matmul_dtype is not None:
        x = x.astype(matmul_dtype)
        w1 = w1.astype(matmul_dtype)
        w2p = w2p.astype(matmul_dtype)

    if B <= batch_tile:
        # Small-batch path (the common RL-rollout case): gridless pallas_call,
        # everything VMEM-resident, no pipeline prologue/epilogue, no per-step
        # bookkeeping.
        out = pl.pallas_call(
            actor_kernel,
            out_shape=jax.ShapeDtypeStruct((B, a_pad), jnp.float32),
            in_specs=[pl.BlockSpec(memory_space=pltpu.MemorySpace.VMEM)] * 5,
            out_specs=pl.BlockSpec(memory_space=pltpu.MemorySpace.VMEM),
        )(x, w1, b1_2d, w2p, b2p)
        return out[:, :A]

    # Large-batch path: tile ONLY the batch axis.  No wrapper jnp.pad / out[:B]
    # slice: launch a ragged grid over the original arrays — the last block's
    # out-of-range rows are padding garbage whose writes are dropped; every row
    # is computed independently, so valid rows are unaffected.
    # Force an even number of roughly-equal tiles so the "parallel" batch axis
    # splits evenly across v7x's two TensorCores (no-op on v5e/v6e).
    n_tiles = pl.cdiv(B, batch_tile)
    if n_tiles % 2:
        n_tiles += 1
    tb = -(-B // n_tiles)             # balanced tile size
    tb = ((tb + 7) // 8) * 8          # sublane (8) alignment for the block spec
    n_tiles = pl.cdiv(B, tb)

    out = pl.pallas_call(
        actor_kernel,
        out_shape=jax.ShapeDtypeStruct((B, a_pad), jnp.float32),
        grid=(n_tiles,),
        in_specs=[
            pl.BlockSpec((tb, D), lambda i: (i, 0)),       # x: walk the batch
            pl.BlockSpec((D, H), lambda i: (0, 0)),        # w1: VMEM-resident
            pl.BlockSpec((1, H), lambda i: (0, 0)),        # b1: VMEM-resident
            pl.BlockSpec((H, a_pad), lambda i: (0, 0)),    # w2: VMEM-resident
            pl.BlockSpec((1, a_pad), lambda i: (0, 0)),    # b2: VMEM-resident
        ],
        out_specs=pl.BlockSpec((tb, a_pad), lambda i: (i, 0)),
        compiler_params=pltpu.CompilerParams(
            dimension_semantics=("parallel",),             # shard batch across TCs
        ),
    )(x, w1, b1_2d, w2p, b2p)
    return out[:, :A]


def init_actor_params(key, input_size, num_actions, hidden=64):
    """Deterministic init mimicking nn.Linear's uniform(-1/sqrt(fan_in), 1/sqrt(fan_in))."""
    k1, k2, k3, k4 = jax.random.split(key, 4)
    bound1 = 1.0 / jnp.sqrt(jnp.float32(input_size))
    bound2 = 1.0 / jnp.sqrt(jnp.float32(hidden))
    # Stored as (in, out) so the kernel does x @ W (== x @ W_pt.T in PyTorch terms).
    w1 = jax.random.uniform(k1, (input_size, hidden), jnp.float32, -bound1, bound1)
    b1 = jax.random.uniform(k2, (hidden,), jnp.float32, -bound1, bound1)
    w2 = jax.random.uniform(k3, (hidden, num_actions), jnp.float32, -bound2, bound2)
    b2 = jax.random.uniform(k4, (num_actions,), jnp.float32, -bound2, bound2)
    return w1, b1, w2, b2


def _reference(x, w1, b1, w2, b2):
    h = jnp.maximum(x @ w1 + b1, 0.0)
    return jax.nn.softmax(h @ w2 + b2, axis=-1)


if __name__ == "__main__":
    input_size = 32
    num_actions = 8

    key = jax.random.PRNGKey(0)
    kx1, kx2, kp = jax.random.split(key, 3)
    w1_raw, b1_raw, w2_raw, b2_raw = init_actor_params(kp, input_size, num_actions)
    # Param prep is done ONCE here (hoisted out of the per-call forward).
    w1, b1_2d, w2p, b2p = prepare_actor_params(w1_raw, b1_raw, w2_raw, b2_raw)

    # 1) Small batch (RL rollout case) -> gridless, fully VMEM-resident path.
    x_small = jax.random.normal(kx1, (8, input_size), dtype=jnp.float32)
    out_small = jax.block_until_ready(
        actor_forward(x_small, w1, b1_2d, w2p, b2p, num_actions))
    ref_small = _reference(x_small, w1_raw, b1_raw, w2_raw, b2_raw)
    assert out_small.shape == (8, num_actions)
    assert jnp.allclose(out_small, ref_small, atol=2e-3, rtol=2e-3)
    assert jnp.allclose(jnp.sum(out_small, axis=-1), 1.0, atol=1e-5)

    # 2) Batch > batch_tile (not a multiple of the tile) -> ragged batch-tiled
    #    grid path with an even number of balanced tiles, no pad/slice copies.
    x_big = jax.random.normal(kx2, (1200, input_size), dtype=jnp.float32)
    out_big = jax.block_until_ready(
        actor_forward(x_big, w1, b1_2d, w2p, b2p, num_actions, batch_tile=512))
    ref_big = _reference(x_big, w1_raw, b1_raw, w2_raw, b2_raw)
    assert out_big.shape == (1200, num_actions)
    assert jnp.allclose(out_big, ref_big, atol=2e-3, rtol=2e-3)
    assert jnp.allclose(jnp.sum(out_big, axis=-1), 1.0, atol=1e-5)

    # 3) Optional bf16 matmul inputs (recommended on v6e/v7x): looser numerics.
    out_bf16 = jax.block_until_ready(
        actor_forward(x_small, w1, b1_2d, w2p, b2p, num_actions,
                      matmul_dtype=jnp.bfloat16))
    assert out_bf16.shape == (8, num_actions)
    assert jnp.allclose(out_bf16, ref_small, atol=5e-2)
    assert jnp.allclose(jnp.sum(out_bf16, axis=-1), 1.0, atol=1e-3)

    print("KERNEL_OK")
</pallas_src>

<mosaic_0001>
module attributes {stable_mosaic.version = 11 : i64} {
  func.func @actor_kernel(%arg0: memref<8x32xf32, #tpu.memory_space<vmem>>, %arg1: memref<32x64xf32, #tpu.memory_space<vmem>>, %arg2: memref<1x64xf32, #tpu.memory_space<vmem>>, %arg3: memref<64x128xf32, #tpu.memory_space<vmem>>, %arg4: memref<1x128xf32, #tpu.memory_space<vmem>>, %arg5: memref<8x128xf32, #tpu.memory_space<vmem>>) attributes {dimension_semantics = [], scalar_prefetch = 0 : i64, scratch_operands = 0 : i64, tpu.core_type = #tpu.core_type<tc>} {
    %c0 = arith.constant 0 : index
    %c0_0 = arith.constant 0 : index
    %0 = vector.load %arg0[%c0, %c0_0] : memref<8x32xf32, #tpu.memory_space<vmem>>, vector<8x32xf32>
    %c0_1 = arith.constant 0 : index
    %c0_2 = arith.constant 0 : index
    %1 = vector.load %arg1[%c0_1, %c0_2] : memref<32x64xf32, #tpu.memory_space<vmem>>, vector<32x64xf32>
    %cst = arith.constant dense<0.000000e+00> : vector<8x64xf32>
    %2 = tpu.matmul %0, %1, %cst {dimension_numbers = #tpu.dot_dimension_numbers<[1], [0], [0], [1], [0, 0, 1, 1], [], []>} : vector<8x32xf32>, vector<32x64xf32>, vector<8x64xf32> -> vector<8x64xf32>
    %c0_3 = arith.constant 0 : index
    %c0_4 = arith.constant 0 : index
    %3 = vector.load %arg2[%c0_3, %c0_4] : memref<1x64xf32, #tpu.memory_space<vmem>>, vector<1x64xf32>
    %4 = vector.broadcast %3 : vector<1x64xf32> to vector<8x64xf32>
    %5 = arith.addf %2, %4 : vector<8x64xf32>
    %cst_5 = arith.constant 0.000000e+00 : f32
    %6 = vector.broadcast %cst_5 : f32 to vector<8x64xf32>
    %7 = arith.maximumf %5, %6 : vector<8x64xf32>
    %c0_6 = arith.constant 0 : index
    %c0_7 = arith.constant 0 : index
    %8 = vector.load %arg3[%c0_6, %c0_7] : memref<64x128xf32, #tpu.memory_space<vmem>>, vector<64x128xf32>
    %cst_8 = arith.constant dense<0.000000e+00> : vector<8x128xf32>
    %9 = tpu.matmul %7, %8, %cst_8 {dimension_numbers = #tpu.dot_dimension_numbers<[1], [0], [0], [1], [0, 0, 1, 1], [], []>} : vector<8x64xf32>, vector<64x128xf32>, vector<8x128xf32> -> vector<8x128xf32>
    %c0_9 = arith.constant 0 : index
    %c0_10 = arith.constant 0 : index
    %10 = vector.load %arg4[%c0_9, %c0_10] : memref<1x128xf32, #tpu.memory_space<vmem>>, vector<1x128xf32>
    %11 = vector.broadcast %10 : vector<1x128xf32> to vector<8x128xf32>
    %12 = arith.addf %9, %11 : vector<8x128xf32>
    %cst_11 = arith.constant dense<0xFF800000> : vector<8xf32>
    %13 = vector.multi_reduction <maximumf>, %12, %cst_11 [1] : vector<8x128xf32> to vector<8xf32>
    %14 = vector.shape_cast %13 : vector<8xf32> to vector<8x1xf32>
    %15 = vector.broadcast %14 : vector<8x1xf32> to vector<8x128xf32>
    %16 = arith.subf %12, %15 : vector<8x128xf32>
    %17 = math.exp %16 : vector<8x128xf32>
    %cst_12 = arith.constant dense<0.000000e+00> : vector<8xf32>
    %18 = vector.multi_reduction <add>, %17, %cst_12 [1] : vector<8x128xf32> to vector<8xf32>
    %19 = vector.shape_cast %18 : vector<8xf32> to vector<8x1xf32>
    %20 = vector.broadcast %19 : vector<8x1xf32> to vector<8x128xf32>
    %21 = arith.divf %17, %20 : vector<8x128xf32>
    %c0_13 = arith.constant 0 : index
    %c0_14 = arith.constant 0 : index
    %22 = vector.load %arg5[%c0_13, %c0_14] : memref<8x128xf32, #tpu.memory_space<vmem>>, vector<8x128xf32>
    tpu.vector_store %arg5[%c0_13, %c0_14], %21 {strides = array<i32>} : memref<8x128xf32, #tpu.memory_space<vmem>>, vector<8x128xf32>,
    return
  }
}

</mosaic_0001>

<bundles_post_ra>
// kernel: tpu_custom_call.1
= control target key start
LH: loop header
LB: loop body
LE: loop exit
PB: predicated region body
PF: predicated region fallthrough
CT: control target
= control target key end

     0   :  { %10 = vsyncpa [#allocation3], 0  ;;  %s534_s0 = inlined_call_operand.hbm [shape: f32[8,32], index: 0, kind: input, shape index: {}]   ;;  %s535_s1 = inlined_call_operand.hbm [shape: f32[32,64], index: 1, kind: input, shape index: {}]   ;;  %s536_s2 = inlined_call_operand.vmem [shape: f32[1,64], index: 2, kind: input, shape index: {}]   ;;  %s537_s3 = inlined_call_operand.hbm [shape: f32[64,128], index: 3, kind: input, shape index: {}]   ;;  %s538_s4 = inlined_call_operand.vmem [shape: f32[1,128], index: 4, kind: input, shape index: {}]   ;;  %s539_s5 = inlined_call_operand.hbm [shape: f32[8,128], index: 5, kind: output, shape index: {}]  }
   0x1   :  { %11 = vsyncpa [#allocation6], 0 }
   0x2   :  { %12 = vsyncpa [#allocation4], 0  ;;  %s435_s18 = smov [#allocation5]   ;;  %s341_s22 = scalar_lea.hbm %s535_s1, 512 }
   0x3   :  { %s28_s19 = sshll.u32 %s435_s18, 4  ;;  %p342_p0 = scmp.ne.s32.totalorder %s535_s1, %s341_s22  ;;  %s29_s19 = int_to_ptr.vmem [resolvable:$true] %s28_s19 }
   0x4   :  { %p345_p1 = scmp.lt.u32.totalorder %s341_s22, %s535_s1 }
   0x6   :  { %p347_p2 = pnand %p345_p1, %p342_p0 }
   0x8   :  { %350 = shalt.err (!%p347_p2)
}
   0x9   :  { %s351_s27 = scalar_lea.vmem %s29_s19, 512  ;;  %p356_p4 = scmp.lt.s32.totalorder %s29_s19, %s29_s19 }
   0xa   :  { %p352_p3 = scmp.ne.s32.totalorder %s29_s19, %s351_s27  ;;  %p357_p5 = scmp.lt.s32.totalorder %s351_s27, %s351_s27 }
   0xc   :  { %p358_p6 = por %p357_p5, %p356_p4 }
   0xe   :  { %p359_p7 = pnand %p358_p6, %p352_p3 }
  0x10   :  { %362 = shalt.err (!%p359_p7)
}
  0x11   :  { %s436_s28 = smov 128   ;;  %s437_s29 = smov 8  }
  0x12   :  { %34 = dma.hbm_to_vmem [thread:$0]  %s535_s1, 512, %s29_s19, [#allocation6], %s436_s28, %s436_s28, %s437_s29  }
  0x13   :  { %s438_s7 = smov [#allocation2]   ;;  %s439_s9 = smov [#allocation7]  }
  0x14   :  { %s19_s8 = sshll.u32 %s438_s7, 4  ;;  %s42_s10 = sshll.u32 %s439_s9, 4  ;;  %s20_s8 = int_to_ptr.vmem [resolvable:$true] %s19_s8  ;;  %s43_s10 = int_to_ptr.vmem [resolvable:$true] %s42_s10 }
  0x15   :  { %s363_s13 = scalar_lea.hbm %s534_s0, 128 }
  0x16   :  { %p364_p8 = scmp.ne.s32.totalorder %s534_s0, %s363_s13  ;;  %p367_p9 = scmp.lt.u32.totalorder %s363_s13, %s534_s0 }
  0x18   :  { %p369_p10 = pnand %p367_p9, %p364_p8 }
  0x1a   :  { %372 = shalt.err (!%p369_p10)
}
  0x1b   :  { %s373_s1 = scalar_lea.vmem %s20_s8, 128  ;;  %p378_p12 = scmp.lt.s32.totalorder %s20_s8, %s20_s8 }
  0x1c   :  { %p374_p11 = scmp.ne.s32.totalorder %s20_s8, %s373_s1  ;;  %p379_p13 = scmp.lt.s32.totalorder %s373_s1, %s373_s1 }
  0x1e   :  { %p380_p0 = por %p379_p13, %p378_p12 }
  0x20   :  { %p381_p1 = pnand %p380_p0, %p374_p11 }
  0x22   :  { %384 = shalt.err (!%p381_p1)
}
  0x23   :  { %22 = dma.hbm_to_vmem [thread:$0]  %s534_s0, 128, %s20_s8, [#allocation3]  }
  0x24   :  { %s385_s22 = scalar_lea.hbm %s537_s3, 1024 }
  0x25   :  { %p386_p2 = scmp.ne.s32.totalorder %s537_s3, %s385_s22  ;;  %p389_p3 = scmp.lt.u32.totalorder %s385_s22, %s537_s3 }
  0x27   :  { %p391_p4 = pnand %p389_p3, %p386_p2 }
  0x29   :  { %394 = shalt.err (!%p391_p4)
}
  0x2a   :  { %s395_s27 = scalar_lea.vmem %s43_s10, 1024  ;;  %p400_p6 = scmp.lt.s32.totalorder %s43_s10, %s43_s10 }
  0x2b   :  { %p396_p5 = scmp.ne.s32.totalorder %s43_s10, %s395_s27  ;;  %p401_p7 = scmp.lt.s32.totalorder %s395_s27, %s395_s27 }
  0x2d   :  { %p402_p8 = por %p401_p7, %p400_p6 }
  0x2f   :  { %p403_p9 = pnand %p402_p8, %p396_p5 }
  0x31   :  { %406 = shalt.err (!%p403_p9)
}
  0x32   :  { %48 = dma.hbm_to_vmem [thread:$0]  %s537_s3, 1024, %s43_s10, [#allocation6], %s436_s28, %s436_s28, %s437_s29  }
  0x33   :  { %429 = dma.done.wait [#allocation3], 128  }
  0x34   :  { %430 = vsyncadd [#allocation3], 4294967168 }
  0x35   :  { %431 = dma.done.wait [#allocation6], 1536  }
  0x36   :  { %432 = vsyncadd [#allocation6], 4294965760  ;;  %v440_v0 = vmov 0.0|0.0   ;;  %vm441_vm0 = vmmov 0   ;;  %v442_v1 = vmov 0.0   ;;  %v61_v2 = vld [vmem:[#allocation5] sm:$0xff] }
  0x37   :  { %310 = vmatprep.subr.bf16.mxu0 %v440_v0  ;;  %288 = vmatprep.mubr.msk.f32.mxu0 %vm441_vm0, %v442_v1  ;;  %v62_v3 = vld [vmem:[#allocation5 + $0x8] sm:$0xff]  ;;  %v63_v4 = vld [vmem:[#allocation5 + $0x10] sm:$0xff]  ;;  %v64_v6 = vld [vmem:[#allocation5 + $0x18] sm:$0xff]  ;;  %vm72_vm1 = vcmask 261120   ;;  %vm162_vm2 = vcmask 523264  }
  0x38   :  { %316 = vmatprep.subr.bf16.mxu1 %v440_v0  ;;  %307 = vmatprep.mubr.msk.f32.mxu1 %vm441_vm0, %v442_v1  ;;  %v311_v5 = vpack.c.bf16 %v62_v3, %v61_v2  ;;  %v147_v7 = vld [vmem:[#allocation7] sm:$0xff]  ;;  %v148_v8 = vld [vmem:[#allocation7 + $0x8] sm:$0xff]  ;;  %v149_v9 = vld [vmem:[#allocation7 + $0x10] sm:$0xff]  ;;  %v314_v11 = vpack.c.bf16 %v64_v6, %v63_v4 }
  0x39   :  { %v150_v10 = vld [vmem:[#allocation7 + $0x18] sm:$0xff]  ;;  %v317_v12 = vpack.c.bf16 %v148_v8, %v147_v7  ;;  %v151_v14 = vld [vmem:[#allocation7 + $0x20] sm:$0xff]  ;;  %v152_v15 = vld [vmem:[#allocation7 + $0x28] sm:$0xff] }
  0x3a   :  { %312 = vmatpush3.bf16.msra.mxu0 %v311_v5  ;;  %v320_v13 = vpack.c.bf16 %v150_v10, %v149_v9  ;;  %v60_v16 = vld [vmem:[#allocation2] sm:$0xff]  ;;  %v323_v17 = vpack.c.bf16 %v152_v15, %v151_v14  ;;  %v153_v18 = vld [vmem:[#allocation7 + $0x30] sm:$0xff] }
  0x3b   :  { %313 = vmatprep.subr.bf16.mxu0 %v440_v0  ;;  %318 = vmatpush3.bf16.msra.mxu1 %v317_v12  ;;  %v154_v19 = vld [vmem:[#allocation7 + $0x38] sm:$0xff] }
  0x3c   :  { %319 = vmatprep.subr.bf16.mxu1 %v440_v0  ;;  %v326_v20 = vpack.c.bf16 %v154_v19, %v153_v18  ;;  %v262_v21 = vld [vmem:[%s536_s2] ss:$0 sm:$0xff]  ;;  %s443_s2 = smov [#allocation8]  }
  0x3d   :  { %v264_v26 = vld [vmem:[%s538_s4] ss:$0 sm:$0xff]  ;;  %s252_s7 = sshll.u32 %s443_s2, 4  ;;  %s253_s7 = int_to_ptr.vmem [resolvable:$true] %s252_s7 }
  0x3e   :  { %315 = vmatpush3.bf16.msra.mxu0 %v314_v11  ;;  %s407_s8 = scalar_lea.vmem %s253_s7, 128  ;;  %p412_p11 = scmp.lt.s32.totalorder %s253_s7, %s253_s7 }
  0x3f   :  { %321 = vmatpush3.bf16.msra.mxu1 %v320_v13  ;;  %p408_p10 = scmp.ne.s32.totalorder %s253_s7, %s407_s8  ;;  %p413_p12 = scmp.lt.s32.totalorder %s407_s8, %s407_s8 }
  0x40   :  { %322 = vmatprep.subr.bf16.mxu1 %v440_v0 }
  0x41   :  { %289 = vmatmul.mubr.msk.f32.vlgmr.msra.gmra.mrb[0].mxu0 %vm72_vm1, %v60_v16  ;;  %p414_p13 = por %p413_p12, %p412_p11 }
  0x43   :  { %324 = vmatpush3.bf16.msra.mxu1 %v323_v17  ;;  %p415_p0 = pnand %p414_p13, %p408_p10 }
  0x44   :  { %325 = vmatprep.subr.bf16.mxu1 %v440_v0 }
  0x47   :  { %327 = vmatpush3.bf16.msra.mxu1 %v326_v20 }
 0x114   :  { %v142_v22 = vpop.f32.mrb[0].mxu0 }
 0x115   :  { %v143_v23 = vadd.f32 %v262_v21, %v142_v22  ;;  %v290_v24 = vpop.f32.mrb[1].mxu0 }
 0x117   :  { %v146_v25 = vmax.f32 %v143_v23, 0.0 }
 0x119   :  { %308 = vmatmul.mubr.msk.f32.vlgmr.msra.gmra.mrb[0].mxu1 %vm162_vm2, %v146_v25 }
 0x1ec   :  { %v232_v27 = vpop.f32.mrb[0].mxu1 }
 0x1ed   :  { %v233_v28 = vadd.f32 %v264_v26, %v232_v27  ;;  %v309_v29 = vpop.f32.mrb[1].mxu1 }
 0x1ef   :  { %236 = vmax.xlane.f32.xlu0 %v233_v28 }
 0x27c   :  { %v237_v30 = vpop.xlane.xlu0 %236 }
 0x27d   :  { %v238_v31 = vsub.f32 %v233_v28, %v237_v30 }
 0x27f   :  { %v239_v32 = vmul.f32 1.442695, %v238_v31 }
 0x281   :  { %337 = vpow2.f32 %v239_v32 }
 0x28b   :  { %v338_v33 = vpop.eup %337 }
 0x28c   :  { %241 = vadd.xlane.f32.xlu0 %v338_v33 }
 0x319   :  { %v242_v34 = vpop.xlane.xlu0 %241 }
 0x31a   :  { %339 = vrcp.f32 %v242_v34 }
 0x324   :  { %v340_v35 = vpop.eup %339 }
 0x325   :  { %v244_v36 = vmul.f32 %v340_v35, %v338_v33 }
 0x327   :  { %245 = vst [vmem:[#allocation8] sm:$0xff] %v244_v36 }
 0x328   :  { %418 = shalt.err (!%p415_p0)
}
 0x329   :  { %s419_s10 = scalar_lea.hbm %s539_s5, 128 }
 0x32a   :  { %p420_p1 = scmp.ne.s32.totalorder %s539_s5, %s419_s10  ;;  %p423_p2 = scmp.lt.u32.totalorder %s419_s10, %s539_s5 }
 0x32c   :  { %p425_p3 = pnand %p423_p2, %p420_p1 }
 0x32e   :  { %428 = shalt.err (!%p425_p3)
}
 0x32f   :  { %255 = dma.vmem_to_hbm [thread:$0]  %s253_s7, 128, %s539_s5, [#allocation4]  }
 0x330   :  { %433 = dma.done.wait [#allocation4], 128  }
 0x331   :  { %434 = vsyncadd [#allocation4], 4294967168 }
 0x332   :  { %259 = vsyncpa [#allocation3], 1 }
 0x333   :  { %260 = vsyncpa [#allocation6], 1 }
 0x334   :  { %261 = vsyncpa [#allocation4], 1 }

</bundles_post_ra>
